<compile_context>
chip_gen: v7x
topology: tpu7x:2x2x1
jax: 0.10.0
libtpu: 0.0.40
codegen_flags: <defaults>
</compile_context>

<pallas_src>
import jax
import jax.numpy as jnp
import numpy as np
from jax import lax
from jax.experimental import pallas as pl
from jax.experimental.pallas import tpu as pltpu

# ---------------------------------------------------------------------------
# Problem sizes (small, consistent with the module's forward)
# ---------------------------------------------------------------------------
B = 2             # batch
S = 8             # sequence length
H = 32            # hidden_dim
NH = 4            # n_heads
HD = H // NH      # head_dim
PF = 64           # pf_dim
BS = B * S        # rows of the folded activation slab
EPS = 1e-5
NEG_SLOPE = 0.01  # torch.nn.LeakyReLU default

_VMEM = pltpu.MemorySpace.VMEM


def _leaky_relu(x):
    return jnp.where(x >= 0, x, NEG_SLOPE * x)


def _layernorm(x, gamma, beta):
    mu = jnp.mean(x, axis=-1, keepdims=True)
    var = jnp.mean((x - mu) ** 2, axis=-1, keepdims=True)
    return (x - mu) * lax.rsqrt(var + EPS) * gamma + beta


# ---------------------------------------------------------------------------
# Pallas kernel: single grid step, whole (B*S, H) slab at once
# ---------------------------------------------------------------------------
def encoder_layer_kernel(
    x_ref,        # (BS, H)       activations, batch folded into rows
    mask_ref,     # (BS, BS)      precomputed block-diagonal batch mask (0 / -1e30)
    wqkv_ref,     # (H, 3H)       fused QKV weights (Q columns pre-scaled by 1/sqrt(HD))
    bqkv_ref,     # (1, 3H)       fused QKV biases  (Q part pre-scaled)
    wo_ref,       # (H, H)        output projection
    w1_ref,       # (H, PF)
    w2_ref,       # (PF, H)
    vec_ref,      # (8, PF)       packed LN params + biases
    out_ref,      # (BS, H)
):
    x = x_ref[...].astype(jnp.float32)                         # (BS, H)
    vecs = vec_ref[...]
    ln1_g = vecs[0:1, :H]
    ln1_b = vecs[1:2, :H]
    ln2_g = vecs[2:3, :H]
    ln2_b = vecs[3:4, :H]
    bo    = vecs[4:5, :H]
    b1    = vecs[5:6, :PF]
    b2    = vecs[6:7, :H]

    # ---- self_attn_layer_norm (pre-norm) ----
    h = _layernorm(x, ln1_g, ln1_b)                            # (BS, H)

    # ---- fused QKV projection: ONE full-width matmul (scale folded into Q) ----
    qkv = jnp.dot(h, wqkv_ref[...],
                  preferred_element_type=jnp.float32) + bqkv_ref[...]   # (BS, 3H)

    # ---- per-head attention over folded (B*S) rows; cross-batch entries are
    #      killed by the precomputed block-diagonal -1e30 mask.  Every row has
    #      exactly S unmasked entries, so the softmax never degenerates. ----
    mask = mask_ref[...]                                       # (BS, BS)
    ctx_heads = []
    for hh in range(NH):                                       # static unroll, NH=4
        q_h = qkv[:, 0 * H + hh * HD: 0 * H + (hh + 1) * HD]   # (BS, HD), already /sqrt(HD)
        k_h = qkv[:, 1 * H + hh * HD: 1 * H + (hh + 1) * HD]
        v_h = qkv[:, 2 * H + hh * HD: 2 * H + (hh + 1) * HD]
        e = lax.dot_general(q_h, k_h, (((1,), (1,)), ((), ())),
                            preferred_element_type=jnp.float32) + mask  # (BS, BS)
        m = jnp.max(e, axis=-1, keepdims=True)
        p = jnp.exp(e - m)
        denom = jnp.sum(p, axis=-1, keepdims=True)
        a = p / denom                                          # exact softmax
        ctx_heads.append(jnp.dot(a, v_h, preferred_element_type=jnp.float32))

    # ---- head recombination folded into ONE output-projection matmul ----
    ctx = jnp.concatenate(ctx_heads, axis=-1)                  # (BS, H), head-major lanes
    attn_out = jnp.dot(ctx, wo_ref[...],
                       preferred_element_type=jnp.float32) + bo

    # ---- residual 1 (dropout = identity in eval) ----
    src1 = attn_out + x

    # ---- ff_layer_norm + position-wise feedforward (LeakyReLU after both) ----
    h2 = _layernorm(src1, ln2_g, ln2_b)
    f = _leaky_relu(jnp.dot(h2, w1_ref[...],
                            preferred_element_type=jnp.float32) + b1)
    f = _leaky_relu(jnp.dot(f, w2_ref[...],
                            preferred_element_type=jnp.float32) + b2)

    # ---- residual 2 ----
    out_ref[...] = (src1 + f).astype(out_ref.dtype)


# ---------------------------------------------------------------------------
# Wrapper: single pallas_call, no grid, every operand pinned to VMEM
# ---------------------------------------------------------------------------
@jax.jit
def encoder_layer(src, packed):
    mask, wqkv, bqkv, wo, w1, w2, vecs = packed
    x2 = src.reshape(BS, H)
    out2 = pl.pallas_call(
        encoder_layer_kernel,
        out_shape=jax.ShapeDtypeStruct((BS, H), src.dtype),
        in_specs=[pl.BlockSpec(memory_space=_VMEM)] * 8,
        out_specs=pl.BlockSpec(memory_space=_VMEM),
    )(x2, mask, wqkv, bqkv, wo, w1, w2, vecs)
    return out2.reshape(B, S, H)


# ---------------------------------------------------------------------------
# One-time parameter packing (outside the jitted forward)
# ---------------------------------------------------------------------------
def pack_params(params):
    (ln1_g, ln1_b, wq, bq, wk, bk, wv, bv, wo, bo,
     ln2_g, ln2_b, w1, b1, w2, b2) = params
    inv_scale = jnp.float32(1.0 / np.sqrt(HD))

    # Fused 2-D QKV weight/bias; 1/sqrt(head_dim) folded into the Q columns.
    wqkv = jnp.concatenate([wq * inv_scale, wk, wv], axis=1)       # (H, 3H)
    bqkv = jnp.concatenate([bq * inv_scale, bk, bv], axis=1)       # (1, 3H)

    def pad_row(v):
        v = v.reshape(-1).astype(jnp.float32)
        return jnp.pad(v, (0, PF - v.shape[0]))

    vecs = jnp.stack([
        pad_row(ln1_g), pad_row(ln1_b), pad_row(ln2_g), pad_row(ln2_b),
        pad_row(bo), pad_row(b1), pad_row(b2), jnp.zeros((PF,), jnp.float32),
    ], axis=0)                                                     # (8, PF)

    # Block-diagonal batch mask over folded rows (0 within a batch, -1e30 across).
    row_b = np.arange(BS)[:, None] // S
    col_b = np.arange(BS)[None, :] // S
    mask = jnp.asarray(np.where(row_b == col_b, 0.0, -1e30), jnp.float32)  # (BS, BS)

    return (mask, wqkv.astype(jnp.float32), bqkv.astype(jnp.float32),
            wo.astype(jnp.float32), w1.astype(jnp.float32),
            w2.astype(jnp.float32), vecs)


# ---------------------------------------------------------------------------
# Pure-JAX reference (unpacked params, same math) for correctness check
# ---------------------------------------------------------------------------
def encoder_layer_ref(src, params):
    (ln1_g, ln1_b, wq, bq, wk, bk, wv, bv, wo, bo,
     ln2_g, ln2_b, w1, b1, w2, b2) = params
    x = src.astype(jnp.float32)
    h = _layernorm(x, ln1_g[0], ln1_b[0])
    q = h @ wq + bq[0]
    k = h @ wk + bk[0]
    v = h @ wv + bv[0]
    q = q.reshape(B, S, NH, HD).transpose(0, 2, 1, 3)
    k = k.reshape(B, S, NH, HD).transpose(0, 2, 1, 3)
    v = v.reshape(B, S, NH, HD).transpose(0, 2, 1, 3)
    energy = jnp.einsum("bhqd,bhkd->bhqk", q, k) / jnp.sqrt(jnp.float32(HD))
    attn = jax.nn.softmax(energy, axis=-1)
    o = jnp.einsum("bhqk,bhkd->bhqd", attn, v).transpose(0, 2, 1, 3).reshape(B, S, H)
    o = o @ wo + bo[0]
    src1 = o + x
    h2 = _layernorm(src1, ln2_g[0], ln2_b[0])
    f = _leaky_relu(h2 @ w1 + b1[0])
    f = _leaky_relu(f @ w2 + b2[0])
    return src1 + f


def init_params(key):
    ks = jax.random.split(key, 8)

    def lin(k, fan_in, fan_out):
        # Uniform(-1/sqrt(fan_in), 1/sqrt(fan_in)) like torch.nn.Linear default.
        bound = 1.0 / np.sqrt(fan_in)
        kw, kb = jax.random.split(k)
        w = jax.random.uniform(kw, (fan_in, fan_out), jnp.float32, -bound, bound)
        b = jax.random.uniform(kb, (1, fan_out), jnp.float32, -bound, bound)
        return w, b

    wq, bq = lin(ks[0], H, H)
    wk, bk = lin(ks[1], H, H)
    wv, bv = lin(ks[2], H, H)
    wo, bo = lin(ks[3], H, H)
    w1, b1 = lin(ks[4], H, PF)
    w2, b2 = lin(ks[5], PF, H)
    ln1_g = jnp.ones((1, H), jnp.float32)
    ln1_b = jnp.zeros((1, H), jnp.float32)
    ln2_g = jnp.ones((1, H), jnp.float32)
    ln2_b = jnp.zeros((1, H), jnp.float32)
    return (ln1_g, ln1_b, wq, bq, wk, bk, wv, bv, wo, bo,
            ln2_g, ln2_b, w1, b1, w2, b2)


# TODO(synk): train-mode dropout (RNG masks) is not implemented; eval-mode
# identity is used, matching the module's inference forward.

if __name__ == "__main__":
    key = jax.random.PRNGKey(0)
    k_x, k_p = jax.random.split(key)
    src = jax.random.normal(k_x, (B, S, H), jnp.float32)
    params = init_params(k_p)
    packed = pack_params(params)        # one-time packing, not per-call work

    out = jax.block_until_ready(encoder_layer(src, packed))

    ref = encoder_layer_ref(src, params)
    # Softmax is now exact (no approximate reciprocal); the remaining tolerance
    # covers differences between the XLA reference's default-precision f32
    # matmuls and the Pallas MXU f32 path.
    np.testing.assert_allclose(np.asarray(out), np.asarray(ref),
                               rtol=1e-2, atol=1e-2)
    print("KERNEL_OK")
</pallas_src>

<mosaic_0001>
module attributes {stable_mosaic.version = 11 : i64} {
  func.func @encoder_layer_kernel(%arg0: memref<16x32xf32, #tpu.memory_space<vmem>>, %arg1: memref<16x16xf32, #tpu.memory_space<vmem>>, %arg2: memref<32x96xf32, #tpu.memory_space<vmem>>, %arg3: memref<1x96xf32, #tpu.memory_space<vmem>>, %arg4: memref<32x32xf32, #tpu.memory_space<vmem>>, %arg5: memref<32x64xf32, #tpu.memory_space<vmem>>, %arg6: memref<64x32xf32, #tpu.memory_space<vmem>>, %arg7: memref<8x64xf32, #tpu.memory_space<vmem>>, %arg8: memref<16x32xf32, #tpu.memory_space<vmem>>) attributes {dimension_semantics = [], scalar_prefetch = 0 : i64, scratch_operands = 0 : i64, tpu.core_type = #tpu.core_type<tc>} {
    %c0 = arith.constant 0 : index
    %c0_0 = arith.constant 0 : index
    %0 = vector.load %arg0[%c0, %c0_0] : memref<16x32xf32, #tpu.memory_space<vmem>>, vector<16x32xf32>
    %c0_1 = arith.constant 0 : index
    %c0_2 = arith.constant 0 : index
    %1 = vector.load %arg7[%c0_1, %c0_2] : memref<8x64xf32, #tpu.memory_space<vmem>>, vector<8x64xf32>
    %2 = vector.extract_strided_slice %1 {offsets = [0, 0], sizes = [1, 32], strides = [1, 1]} : vector<8x64xf32> to vector<1x32xf32>
    %3 = vector.extract_strided_slice %1 {offsets = [1, 0], sizes = [1, 32], strides = [1, 1]} : vector<8x64xf32> to vector<1x32xf32>
    %4 = vector.extract_strided_slice %1 {offsets = [2, 0], sizes = [1, 32], strides = [1, 1]} : vector<8x64xf32> to vector<1x32xf32>
    %5 = vector.extract_strided_slice %1 {offsets = [3, 0], sizes = [1, 32], strides = [1, 1]} : vector<8x64xf32> to vector<1x32xf32>
    %6 = vector.extract_strided_slice %1 {offsets = [4, 0], sizes = [1, 32], strides = [1, 1]} : vector<8x64xf32> to vector<1x32xf32>
    %7 = vector.extract_strided_slice %1 {offsets = [5, 0], sizes = [1, 64], strides = [1, 1]} : vector<8x64xf32> to vector<1x64xf32>
    %8 = vector.extract_strided_slice %1 {offsets = [6, 0], sizes = [1, 32], strides = [1, 1]} : vector<8x64xf32> to vector<1x32xf32>
    %cst = arith.constant dense<0.000000e+00> : vector<16xf32>
    %9 = vector.multi_reduction <add>, %0, %cst [1] : vector<16x32xf32> to vector<16xf32>
    %10 = vector.shape_cast %9 : vector<16xf32> to vector<16x1xf32>
    %cst_3 = arith.constant 3.200000e+01 : f32
    %11 = vector.broadcast %cst_3 : f32 to vector<16x1xf32>
    %12 = arith.divf %10, %11 : vector<16x1xf32>
    %13 = vector.broadcast %12 : vector<16x1xf32> to vector<16x32xf32>
    %14 = arith.subf %0, %13 : vector<16x32xf32>
    %15 = arith.mulf %14, %14 : vector<16x32xf32>
    %cst_4 = arith.constant dense<0.000000e+00> : vector<16xf32>
    %16 = vector.multi_reduction <add>, %15, %cst_4 [1] : vector<16x32xf32> to vector<16xf32>
    %17 = vector.shape_cast %16 : vector<16xf32> to vector<16x1xf32>
    %cst_5 = arith.constant 3.200000e+01 : f32
    %18 = vector.broadcast %cst_5 : f32 to vector<16x1xf32>
    %19 = arith.divf %17, %18 : vector<16x1xf32>
    %20 = vector.broadcast %12 : vector<16x1xf32> to vector<16x32xf32>
    %21 = arith.subf %0, %20 : vector<16x32xf32>
    %cst_6 = arith.constant 9.99999974E-6 : f32
    %22 = vector.broadcast %cst_6 : f32 to vector<16x1xf32>
    %23 = arith.addf %19, %22 : vector<16x1xf32>
    %24 = math.rsqrt %23 : vector<16x1xf32>
    %25 = vector.broadcast %24 : vector<16x1xf32> to vector<16x32xf32>
    %26 = arith.mulf %21, %25 : vector<16x32xf32>
    %27 = vector.broadcast %2 : vector<1x32xf32> to vector<16x32xf32>
    %28 = arith.mulf %26, %27 : vector<16x32xf32>
    %29 = vector.broadcast %3 : vector<1x32xf32> to vector<16x32xf32>
    %30 = arith.addf %28, %29 : vector<16x32xf32>
    %c0_7 = arith.constant 0 : index
    %c0_8 = arith.constant 0 : index
    %31 = vector.load %arg2[%c0_7, %c0_8] : memref<32x96xf32, #tpu.memory_space<vmem>>, vector<32x96xf32>
    %cst_9 = arith.constant dense<0.000000e+00> : vector<16x96xf32>
    %32 = tpu.matmul %30, %31, %cst_9 {dimension_numbers = #tpu.dot_dimension_numbers<[1], [0], [0], [1], [0, 0, 1, 1], [], []>} : vector<16x32xf32>, vector<32x96xf32>, vector<16x96xf32> -> vector<16x96xf32>
    %c0_10 = arith.constant 0 : index
    %c0_11 = arith.constant 0 : index
    %33 = vector.load %arg3[%c0_10, %c0_11] : memref<1x96xf32, #tpu.memory_space<vmem>>, vector<1x96xf32>
    %34 = vector.broadcast %33 : vector<1x96xf32> to vector<16x96xf32>
    %35 = arith.addf %32, %34 : vector<16x96xf32>
    %c0_12 = arith.constant 0 : index
    %c0_13 = arith.constant 0 : index
    %36 = vector.load %arg1[%c0_12, %c0_13] : memref<16x16xf32, #tpu.memory_space<vmem>>, vector<16x16xf32>
    %37 = vector.extract_strided_slice %35 {offsets = [0, 0], sizes = [16, 8], strides = [1, 1]} : vector<16x96xf32> to vector<16x8xf32>
    %38 = vector.extract_strided_slice %35 {offsets = [0, 32], sizes = [16, 8], strides = [1, 1]} : vector<16x96xf32> to vector<16x8xf32>
    %39 = vector.extract_strided_slice %35 {offsets = [0, 64], sizes = [16, 8], strides = [1, 1]} : vector<16x96xf32> to vector<16x8xf32>
    %cst_14 = arith.constant dense<0.000000e+00> : vector<16x16xf32>
    %40 = tpu.matmul %37, %38, %cst_14 {dimension_numbers = #tpu.dot_dimension_numbers<[1], [1], [0], [0], [0, 0, 1, 0], [], []>} : vector<16x8xf32>, vector<16x8xf32>, vector<16x16xf32> -> vector<16x16xf32>
    %41 = arith.addf %40, %36 : vector<16x16xf32>
    %cst_15 = arith.constant dense<0xFF800000> : vector<16xf32>
    %42 = vector.multi_reduction <maximumf>, %41, %cst_15 [1] : vector<16x16xf32> to vector<16xf32>
    %43 = vector.shape_cast %42 : vector<16xf32> to vector<16x1xf32>
    %44 = vector.broadcast %43 : vector<16x1xf32> to vector<16x16xf32>
    %45 = arith.subf %41, %44 : vector<16x16xf32>
    %46 = math.exp %45 : vector<16x16xf32>
    %cst_16 = arith.constant dense<0.000000e+00> : vector<16xf32>
    %47 = vector.multi_reduction <add>, %46, %cst_16 [1] : vector<16x16xf32> to vector<16xf32>
    %48 = vector.shape_cast %47 : vector<16xf32> to vector<16x1xf32>
    %49 = vector.broadcast %48 : vector<16x1xf32> to vector<16x16xf32>
    %50 = arith.divf %46, %49 : vector<16x16xf32>
    %cst_17 = arith.constant dense<0.000000e+00> : vector<16x8xf32>
    %51 = tpu.matmul %50, %39, %cst_17 {dimension_numbers = #tpu.dot_dimension_numbers<[1], [0], [0], [1], [0, 0, 1, 1], [], []>} : vector<16x16xf32>, vector<16x8xf32>, vector<16x8xf32> -> vector<16x8xf32>
    %52 = vector.extract_strided_slice %35 {offsets = [0, 8], sizes = [16, 8], strides = [1, 1]} : vector<16x96xf32> to vector<16x8xf32>
    %53 = vector.extract_strided_slice %35 {offsets = [0, 40], sizes = [16, 8], strides = [1, 1]} : vector<16x96xf32> to vector<16x8xf32>
    %54 = vector.extract_strided_slice %35 {offsets = [0, 72], sizes = [16, 8], strides = [1, 1]} : vector<16x96xf32> to vector<16x8xf32>
    %cst_18 = arith.constant dense<0.000000e+00> : vector<16x16xf32>
    %55 = tpu.matmul %52, %53, %cst_18 {dimension_numbers = #tpu.dot_dimension_numbers<[1], [1], [0], [0], [0, 0, 1, 0], [], []>} : vector<16x8xf32>, vector<16x8xf32>, vector<16x16xf32> -> vector<16x16xf32>
    %56 = arith.addf %55, %36 : vector<16x16xf32>
    %cst_19 = arith.constant dense<0xFF800000> : vector<16xf32>
    %57 = vector.multi_reduction <maximumf>, %56, %cst_19 [1] : vector<16x16xf32> to vector<16xf32>
    %58 = vector.shape_cast %57 : vector<16xf32> to vector<16x1xf32>
    %59 = vector.broadcast %58 : vector<16x1xf32> to vector<16x16xf32>
    %60 = arith.subf %56, %59 : vector<16x16xf32>
    %61 = math.exp %60 : vector<16x16xf32>
    %cst_20 = arith.constant dense<0.000000e+00> : vector<16xf32>
    %62 = vector.multi_reduction <add>, %61, %cst_20 [1] : vector<16x16xf32> to vector<16xf32>
    %63 = vector.shape_cast %62 : vector<16xf32> to vector<16x1xf32>
    %64 = vector.broadcast %63 : vector<16x1xf32> to vector<16x16xf32>
    %65 = arith.divf %61, %64 : vector<16x16xf32>
    %cst_21 = arith.constant dense<0.000000e+00> : vector<16x8xf32>
    %66 = tpu.matmul %65, %54, %cst_21 {dimension_numbers = #tpu.dot_dimension_numbers<[1], [0], [0], [1], [0, 0, 1, 1], [], []>} : vector<16x16xf32>, vector<16x8xf32>, vector<16x8xf32> -> vector<16x8xf32>
    %67 = vector.extract_strided_slice %35 {offsets = [0, 16], sizes = [16, 8], strides = [1, 1]} : vector<16x96xf32> to vector<16x8xf32>
    %68 = vector.extract_strided_slice %35 {offsets = [0, 48], sizes = [16, 8], strides = [1, 1]} : vector<16x96xf32> to vector<16x8xf32>
    %69 = vector.extract_strided_slice %35 {offsets = [0, 80], sizes = [16, 8], strides = [1, 1]} : vector<16x96xf32> to vector<16x8xf32>
    %cst_22 = arith.constant dense<0.000000e+00> : vector<16x16xf32>
    %70 = tpu.matmul %67, %68, %cst_22 {dimension_numbers = #tpu.dot_dimension_numbers<[1], [1], [0], [0], [0, 0, 1, 0], [], []>} : vector<16x8xf32>, vector<16x8xf32>, vector<16x16xf32> -> vector<16x16xf32>
    %71 = arith.addf %70, %36 : vector<16x16xf32>
    %cst_23 = arith.constant dense<0xFF800000> : vector<16xf32>
    %72 = vector.multi_reduction <maximumf>, %71, %cst_23 [1] : vector<16x16xf32> to vector<16xf32>
    %73 = vector.shape_cast %72 : vector<16xf32> to vector<16x1xf32>
    %74 = vector.broadcast %73 : vector<16x1xf32> to vector<16x16xf32>
    %75 = arith.subf %71, %74 : vector<16x16xf32>
    %76 = math.exp %75 : vector<16x16xf32>
    %cst_24 = arith.constant dense<0.000000e+00> : vector<16xf32>
    %77 = vector.multi_reduction <add>, %76, %cst_24 [1] : vector<16x16xf32> to vector<16xf32>
    %78 = vector.shape_cast %77 : vector<16xf32> to vector<16x1xf32>
    %79 = vector.broadcast %78 : vector<16x1xf32> to vector<16x16xf32>
    %80 = arith.divf %76, %79 : vector<16x16xf32>
    %cst_25 = arith.constant dense<0.000000e+00> : vector<16x8xf32>
    %81 = tpu.matmul %80, %69, %cst_25 {dimension_numbers = #tpu.dot_dimension_numbers<[1], [0], [0], [1], [0, 0, 1, 1], [], []>} : vector<16x16xf32>, vector<16x8xf32>, vector<16x8xf32> -> vector<16x8xf32>
    %82 = vector.extract_strided_slice %35 {offsets = [0, 24], sizes = [16, 8], strides = [1, 1]} : vector<16x96xf32> to vector<16x8xf32>
    %83 = vector.extract_strided_slice %35 {offsets = [0, 56], sizes = [16, 8], strides = [1, 1]} : vector<16x96xf32> to vector<16x8xf32>
    %84 = vector.extract_strided_slice %35 {offsets = [0, 88], sizes = [16, 8], strides = [1, 1]} : vector<16x96xf32> to vector<16x8xf32>
    %cst_26 = arith.constant dense<0.000000e+00> : vector<16x16xf32>
    %85 = tpu.matmul %82, %83, %cst_26 {dimension_numbers = #tpu.dot_dimension_numbers<[1], [1], [0], [0], [0, 0, 1, 0], [], []>} : vector<16x8xf32>, vector<16x8xf32>, vector<16x16xf32> -> vector<16x16xf32>
    %86 = arith.addf %85, %36 : vector<16x16xf32>
    %cst_27 = arith.constant dense<0xFF800000> : vector<16xf32>
    %87 = vector.multi_reduction <maximumf>, %86, %cst_27 [1] : vector<16x16xf32> to vector<16xf32>
    %88 = vector.shape_cast %87 : vector<16xf32> to vector<16x1xf32>
    %89 = vector.broadcast %88 : vector<16x1xf32> to vector<16x16xf32>
    %90 = arith.subf %86, %89 : vector<16x16xf32>
    %91 = math.exp %90 : vector<16x16xf32>
    %cst_28 = arith.constant dense<0.000000e+00> : vector<16xf32>
    %92 = vector.multi_reduction <add>, %91, %cst_28 [1] : vector<16x16xf32> to vector<16xf32>
    %93 = vector.shape_cast %92 : vector<16xf32> to vector<16x1xf32>
    %94 = vector.broadcast %93 : vector<16x1xf32> to vector<16x16xf32>
    %95 = arith.divf %91, %94 : vector<16x16xf32>
    %cst_29 = arith.constant dense<0.000000e+00> : vector<16x8xf32>
    %96 = tpu.matmul %95, %84, %cst_29 {dimension_numbers = #tpu.dot_dimension_numbers<[1], [0], [0], [1], [0, 0, 1, 1], [], []>} : vector<16x16xf32>, vector<16x8xf32>, vector<16x8xf32> -> vector<16x8xf32>
    %97 = tpu.concatenate %51, %66, %81, %96 in 1 : vector<16x8xf32>, vector<16x8xf32>, vector<16x8xf32>, vector<16x8xf32> -> vector<16x32xf32>
    %c0_30 = arith.constant 0 : index
    %c0_31 = arith.constant 0 : index
    %98 = vector.load %arg4[%c0_30, %c0_31] : memref<32x32xf32, #tpu.memory_space<vmem>>, vector<32x32xf32>
    %cst_32 = arith.constant dense<0.000000e+00> : vector<16x32xf32>
    %99 = tpu.matmul %97, %98, %cst_32 {dimension_numbers = #tpu.dot_dimension_numbers<[1], [0], [0], [1], [0, 0, 1, 1], [], []>} : vector<16x32xf32>, vector<32x32xf32>, vector<16x32xf32> -> vector<16x32xf32>
    %100 = vector.broadcast %6 : vector<1x32xf32> to vector<16x32xf32>
    %101 = arith.addf %99, %100 : vector<16x32xf32>
    %102 = arith.addf %101, %0 : vector<16x32xf32>
    %cst_33 = arith.constant dense<0.000000e+00> : vector<16xf32>
    %103 = vector.multi_reduction <add>, %102, %cst_33 [1] : vector<16x32xf32> to vector<16xf32>
    %104 = vector.shape_cast %103 : vector<16xf32> to vector<16x1xf32>
    %cst_34 = arith.constant 3.200000e+01 : f32
    %105 = vector.broadcast %cst_34 : f32 to vector<16x1xf32>
    %106 = arith.divf %104, %105 : vector<16x1xf32>
    %107 = vector.broadcast %106 : vector<16x1xf32> to vector<16x32xf32>
    %108 = arith.subf %102, %107 : vector<16x32xf32>
    %109 = arith.mulf %108, %108 : vector<16x32xf32>
    %cst_35 = arith.constant dense<0.000000e+00> : vector<16xf32>
    %110 = vector.multi_reduction <add>, %109, %cst_35 [1] : vector<16x32xf32> to vector<16xf32>
    %111 = vector.shape_cast %110 : vector<16xf32> to vector<16x1xf32>
    %cst_36 = arith.constant 3.200000e+01 : f32
    %112 = vector.broadcast %cst_36 : f32 to vector<16x1xf32>
    %113 = arith.divf %111, %112 : vector<16x1xf32>
    %114 = vector.broadcast %106 : vector<16x1xf32> to vector<16x32xf32>
    %115 = arith.subf %102, %114 : vector<16x32xf32>
    %cst_37 = arith.constant 9.99999974E-6 : f32
    %116 = vector.broadcast %cst_37 : f32 to vector<16x1xf32>
    %117 = arith.addf %113, %116 : vector<16x1xf32>
    %118 = math.rsqrt %117 : vector<16x1xf32>
    %119 = vector.broadcast %118 : vector<16x1xf32> to vector<16x32xf32>
    %120 = arith.mulf %115, %119 : vector<16x32xf32>
    %121 = vector.broadcast %4 : vector<1x32xf32> to vector<16x32xf32>
    %122 = arith.mulf %120, %121 : vector<16x32xf32>
    %123 = vector.broadcast %5 : vector<1x32xf32> to vector<16x32xf32>
    %124 = arith.addf %122, %123 : vector<16x32xf32>
    %c0_38 = arith.constant 0 : index
    %c0_39 = arith.constant 0 : index
    %125 = vector.load %arg5[%c0_38, %c0_39] : memref<32x64xf32, #tpu.memory_space<vmem>>, vector<32x64xf32>
    %cst_40 = arith.constant dense<0.000000e+00> : vector<16x64xf32>
    %126 = tpu.matmul %124, %125, %cst_40 {dimension_numbers = #tpu.dot_dimension_numbers<[1], [0], [0], [1], [0, 0, 1, 1], [], []>} : vector<16x32xf32>, vector<32x64xf32>, vector<16x64xf32> -> vector<16x64xf32>
    %127 = vector.broadcast %7 : vector<1x64xf32> to vector<16x64xf32>
    %128 = arith.addf %126, %127 : vector<16x64xf32>
    %cst_41 = arith.constant 0.000000e+00 : f32
    %129 = vector.broadcast %cst_41 : f32 to vector<16x64xf32>
    %130 = arith.cmpf oge, %128, %129 : vector<16x64xf32>
    %cst_42 = arith.constant 0.00999999977 : f32
    %131 = vector.broadcast %cst_42 : f32 to vector<16x64xf32>
    %132 = arith.mulf %131, %128 : vector<16x64xf32>
    %133 = arith.select %130, %128, %132 : vector<16x64xi1>, vector<16x64xf32>
    %c0_43 = arith.constant 0 : index
    %c0_44 = arith.constant 0 : index
    %134 = vector.load %arg6[%c0_43, %c0_44] : memref<64x32xf32, #tpu.memory_space<vmem>>, vector<64x32xf32>
    %cst_45 = arith.constant dense<0.000000e+00> : vector<16x32xf32>
    %135 = tpu.matmul %133, %134, %cst_45 {dimension_numbers = #tpu.dot_dimension_numbers<[1], [0], [0], [1], [0, 0, 1, 1], [], []>} : vector<16x64xf32>, vector<64x32xf32>, vector<16x32xf32> -> vector<16x32xf32>
    %136 = vector.broadcast %8 : vector<1x32xf32> to vector<16x32xf32>
    %137 = arith.addf %135, %136 : vector<16x32xf32>
    %cst_46 = arith.constant 0.000000e+00 : f32
    %138 = vector.broadcast %cst_46 : f32 to vector<16x32xf32>
    %139 = arith.cmpf oge, %137, %138 : vector<16x32xf32>
    %cst_47 = arith.constant 0.00999999977 : f32
    %140 = vector.broadcast %cst_47 : f32 to vector<16x32xf32>
    %141 = arith.mulf %140, %137 : vector<16x32xf32>
    %142 = arith.select %139, %137, %141 : vector<16x32xi1>, vector<16x32xf32>
    %143 = arith.addf %102, %142 : vector<16x32xf32>
    %c0_48 = arith.constant 0 : index
    %c0_49 = arith.constant 0 : index
    %144 = vector.load %arg8[%c0_48, %c0_49] : memref<16x32xf32, #tpu.memory_space<vmem>>, vector<16x32xf32>
    tpu.vector_store %arg8[%c0_48, %c0_49], %143 {strides = array<i32>} : memref<16x32xf32, #tpu.memory_space<vmem>>, vector<16x32xf32>,
    return
  }
}

</mosaic_0001>

<bundles_post_ra>
// kernel: encoder_layer.1
= control target key start
LH: loop header
LB: loop body
LE: loop exit
PB: predicated region body
PF: predicated region fallthrough
CT: control target
= control target key end

     0   :  { %13 = vsyncpa [#allocation3], 0  ;;  %s2159_s0 = inlined_call_operand.hbm [shape: f32[16,32], index: 0, kind: input, shape index: {}]   ;;  %s2160_s1 = inlined_call_operand.hbm [shape: f32[16,16], index: 1, kind: input, shape index: {}]   ;;  %s2161_s2 = inlined_call_operand.vmem [shape: f32[32,96], index: 2, kind: input, shape index: {}]   ;;  %s2162_s3 = inlined_call_operand.vmem [shape: f32[1,96], index: 3, kind: input, shape index: {}]   ;;  %s2163_s4 = inlined_call_operand.vmem [shape: f32[32,32], index: 4, kind: input, shape index: {}]   ;;  %s2164_s5 = inlined_call_operand.vmem [shape: f32[32,64], index: 5, kind: input, shape index: {}]   ;;  %s2165_s6 = inlined_call_operand.vmem [shape: f32[64,32], index: 6, kind: input, shape index: {}]   ;;  %s2166_s7 = inlined_call_operand.vmem [shape: f32[8,64], index: 7, kind: input, shape index: {}]   ;;  %s2167_s8 = inlined_call_operand.hbm [shape: f32[16,32], index: 8, kind: output, shape index: {}]  }
   0x1   :  { %14 = vsyncpa [#allocation6], 0 }
   0x2   :  { %15 = vsyncpa [#allocation4], 0  ;;  %s1823_s27 = smov [#allocation2]   ;;  %s1751_s9 = scalar_lea.hbm %s2159_s0, 256 }
   0x3   :  { %s21_s28 = sshll.u32 %s1823_s27, 4  ;;  %p1752_p0 = scmp.ne.s32.totalorder %s2159_s0, %s1751_s9  ;;  %s22_s28 = int_to_ptr.vmem [resolvable:$true] %s21_s28 }
   0x4   :  { %p1755_p1 = scmp.lt.u32.totalorder %s1751_s9, %s2159_s0 }
   0x6   :  { %p1757_p2 = pnand %p1755_p1, %p1752_p0 }
   0x8   :  { %1760 = shalt.err (!%p1757_p2)
}
   0x9   :  { %s1761_s14 = scalar_lea.vmem %s22_s28, 256  ;;  %p1766_p4 = scmp.lt.s32.totalorder %s22_s28, %s22_s28 }
   0xa   :  { %p1762_p3 = scmp.ne.s32.totalorder %s22_s28, %s1761_s14  ;;  %p1767_p5 = scmp.lt.s32.totalorder %s1761_s14, %s1761_s14 }
   0xc   :  { %p1768_p6 = por %p1767_p5, %p1766_p4 }
   0xe   :  { %p1769_p7 = pnand %p1768_p6, %p1762_p3 }
  0x10   :  { %1772 = shalt.err (!%p1769_p7)
}
  0x11   :  { %s1824_s15 = smov 128   ;;  %s1825_s16 = smov 8  }
  0x12   :  { %27 = dma.hbm_to_vmem [thread:$0]  %s2159_s0, 256, %s22_s28, [#allocation3], %s1824_s15, %s1824_s15, %s1825_s16  }
  0x13   :  { %s1826_s19 = smov [#allocation5]   ;;  %s1773_s23 = scalar_lea.hbm %s2160_s1, 256 }
  0x14   :  { %s33_s20 = sshll.u32 %s1826_s19, 4  ;;  %p1774_p8 = scmp.ne.s32.totalorder %s2160_s1, %s1773_s23  ;;  %s34_s20 = int_to_ptr.vmem [resolvable:$true] %s33_s20 }
  0x15   :  { %p1777_p9 = scmp.lt.u32.totalorder %s1773_s23, %s2160_s1 }
  0x17   :  { %p1779_p10 = pnand %p1777_p9, %p1774_p8 }
  0x19   :  { %1782 = shalt.err (!%p1779_p10)
}
  0x1a   :  { %s1783_s29 = scalar_lea.vmem %s34_s20, 256  ;;  %p1788_p12 = scmp.lt.s32.totalorder %s34_s20, %s34_s20 }
  0x1b   :  { %p1784_p11 = scmp.ne.s32.totalorder %s34_s20, %s1783_s29  ;;  %p1789_p13 = scmp.lt.s32.totalorder %s1783_s29, %s1783_s29 }
  0x1d   :  { %p1790_p0 = por %p1789_p13, %p1788_p12 }
  0x1f   :  { %p1791_p1 = pnand %p1790_p0, %p1784_p11 }
  0x21   :  { %1794 = shalt.err (!%p1791_p1)
}
  0x22   :  { %39 = dma.hbm_to_vmem [thread:$0]  %s2160_s1, 256, %s34_s20, [#allocation6], %s1824_s15, %s1824_s15, %s1825_s16  }
  0x23   :  { %1817 = dma.done.wait [#allocation3], 256  }
  0x24   :  { %1818 = vsyncadd [#allocation3], 4294967040 }
  0x25   :  { %1819 = dma.done.wait [#allocation6], 256  }
  0x26   :  { %1820 = vsyncadd [#allocation6], 4294967040  ;;  %vm61_vm0 = vcmask 261120   ;;  %v1916_v0 = vld [vmem:[#allocation2] sm:$0xff]  ;;  %v1918_v1 = vld [vmem:[#allocation2 + $0x8] sm:$0xff]  ;;  %v89_v22 = vlaneseq  ;;  %vm201_vm1 = vcmask 64512  }
  0x27   :  { %v62_v2 = vsel %vm61_vm0, %v1916_v0, 0.0  ;;  %v65_v3 = vsel %vm61_vm0, %v1918_v1, 0.0  ;;  %v101_v14 = vld [vmem:[%s2161_s2] sm:$0xff]  ;;  %v102_v15 = vld [vmem:[%s2161_s2 + $0x8] sm:$0xff]  ;;  %v103_v16 = vld [vmem:[%s2161_s2 + $0x10] sm:$0xff]  ;;  %s1827_s19 = smov 88  }
  0x28   :  { %63 = vadd.xlane.f32.xlu0 %v62_v2  ;;  %v1573_v17 = vpack.c.bf16 %v102_v15, %v101_v14  ;;  %v104_v18 = vld [vmem:[%s2161_s2 + $0x18] sm:$0xff]  ;;  %v1940_v26 = vshrl.u32 %v89_v22, 7  ;;  %v1946_v29 = vld [vmem:[%s2166_s7] sm:$0xff]  ;;  %s1828_s20 = smov 96   ;;  %vm1972_vm2 = vmpackc.low %vm201_vm1, %vm201_vm1  ;;  %vm285_vm3 = vcmask 130048   ;;  %s1830_s21 = smov 56  }
  0x29   :  { %v1577_v19 = vpack.c.bf16 %v104_v18, %v103_v16  ;;  %v1372_v41 = vld [vmem:[%s2162_s3] ss:$0 sm:$0xff]  ;;  %s1829_s3 = smov 120   ;;  %v1988_v58 = vld [vmem:[#allocation5 + $0x8] sm:$0xff]  ;;  %v1990_v59 = vld [vmem:[#allocation5] sm:$0xff]  ;;  %s1831_s22 = smov 64  }
  0x2a   :  { %1574 = vmatprep.subr.bf16.mxu1 %v1573_v17  ;;  %v91_v28 = vsub.s32 0, %v1940_v26  ;;  %v97_v30 = vsub.s32 1, %v1940_v26  ;;  %s1832_s23 = smov 80   ;;  %s1833_s24 = smov 112   ;;  %vm1023_vm4 = vcmask 195584   ;;  %vm1262_vm7 = vcmask 523264  }
  0x2b   :  { %1576 = vmatpush3.bf16.msra.mxu1 %v1573_v17  ;;  %s1834_s25 = smov 48   ;;  %s1835_s26 = smov 104  }
  0x2c   :  { %66 = vadd.xlane.f32.xlu0 %v65_v3  ;;  %1578 = vmatprep.subr.bf16.mxu1 %v1577_v19  ;;  %v92_v31 = vrot.slane %v1946_v29, %v91_v28  ;;  %v98_v34 = vrot.slane %v1946_v29, %v97_v30  ;;  %s1836_s27 = smov 72   ;;  %s1837_s29 = smov 40  }
  0x2d   :  { %s1838_s0 = smov 16   ;;  %s1839_s14 = smov 24  }
  0x2f   :  { %1580 = vmatpush3.bf16.msra.mxu1 %v1577_v19 }
  0xb5   :  { %v64_v4 = vpop.xlane.xlu0 %63 }
  0xb6   :  { %v69_v5 = vmul.f32 0.03125, %v64_v4 }
  0xb8   :  { %v71_v6 = vsub.f32 %v1916_v0, %v69_v5 }
  0xb9   :  { %v67_v7 = vpop.xlane.xlu0 %66 }
  0xba   :  { %v70_v8 = vmul.f32 0.03125, %v67_v7  ;;  %v73_v9 = vmul.f32 %v71_v6, %v71_v6 }
  0xbc   :  { %v72_v10 = vsub.f32 %v1918_v1, %v70_v8  ;;  %v75_v11 = vsel %vm61_vm0, %v73_v9, 0.0 }
  0xbd   :  { %76 = vadd.xlane.f32.xlu1 %v75_v11 }
  0xbe   :  { %v74_v12 = vmul.f32 %v72_v10, %v72_v10 }
  0xc0   :  { %v78_v13 = vsel %vm61_vm0, %v74_v12, 0.0 }
  0xc1   :  { %79 = vadd.xlane.f32.xlu1 %v78_v13 }
 0x14a   :  { %v77_v20 = vpop.xlane.xlu1 %76 }
 0x14b   :  { %v81_v21 = vmul.f32 0.03125, %v77_v20 }
 0x14d   :  { %v83_v23 = vadd.f32 1e-05, %v81_v21 }
 0x14e   :  { %v80_v24 = vpop.xlane.xlu1 %79 }
 0x14f   :  { %1711 = vrsqrt.f32 %v83_v23  ;;  %v82_v25 = vmul.f32 0.03125, %v80_v24 }
 0x151   :  { %v84_v27 = vadd.f32 1e-05, %v82_v25 }
 0x153   :  { %1713 = vrsqrt.f32 %v84_v27 }
 0x159   :  { %v1712_v32 = vpop.eup %1711 }
 0x15a   :  { %v87_v33 = vmul.f32 %v1712_v32, %v71_v6 }
 0x15c   :  { %v93_v35 = vmul.f32 %v92_v31, %v87_v33 }
 0x15d   :  { %v1714_v36 = vpop.eup %1713 }
 0x15e   :  { %v88_v37 = vmul.f32 %v1714_v36, %v72_v10  ;;  %v99_v38 = vadd.f32 %v98_v34, %v93_v35 }
 0x160   :  { %v94_v39 = vmul.f32 %v92_v31, %v88_v37  ;;  %1473 = vmatprep.mubr.msk.f32.mxu1 %vm61_vm0, %v99_v38 }
 0x162   :  { %v100_v40 = vadd.f32 %v98_v34, %v94_v39 }
 0x164   :  { %1474 = vmatmul.mubr.msk.f32.vlgmr.msra.gmra.mrb[0].mxu1 %vm61_vm0, %v100_v40 }
 0x237   :  { %v1475_v42 = vpop.f32.mrb[0].mxu1 }
 0x238   :  { %v1956_v43 = vadd.f32 %v1475_v42, %v1372_v41  ;;  %v184_v44 = vpop.f32.mrb[1].mxu1 }
 0x239   :  { %v1958_v45 = vadd.f32 %v1372_v41, %v184_v44 }
 0x23b   :  { %1480 = vmatprep.mubr.msk.f32.mxu1 %vm201_vm1, %v1958_v45  ;;  %v1964_v46 = vpack.i.bf16 %v1956_v43, %v1958_v45 }
 0x23d   :  { %1677 = vrot.lane.b32.xlu1 %v1964_v46, %s1827_s19  ;;  %1672 = vrot.lane.b32.xlu0 %v1964_v46, %s1828_s20 }
 0x241   :  { %395 = vrot.lane.b32.xlu1 %v1958_v45, %s1829_s3 }
 0x245   :  { %397 = vrot.lane.b32.xlu1 %v1956_v43, %s1829_s3 }
 0x2af   :  { %v1678_v47 = vpop.permute.xlu1 %1677  ;;  %v1673_v48 = vpop.permute.xlu0 %1672 }
 0x2b0   :  { %v1680_v49 = vunpack.i.h.bf16 %v1678_v47  ;;  %v1679_v50 = vunpack.i.l.bf16 %v1678_v47  ;;  %v1675_v51 = vunpack.i.h.bf16 %v1673_v48  ;;  %v1674_v52 = vunpack.i.l.bf16 %v1673_v48 }
 0x2b2   :  { %v1581_v54 = vpack.c.bf16 %v1675_v51, %v1674_v52  ;;  %v1591_v55 = vpack.c.bf16 %v1680_v49, %v1679_v50 }
 0x2b3   :  { %v396_v56 = vpop.permute.xlu1 %395 }
 0x2b4   :  { %1583 = vmatprep.subr.msk.bf16.mxu1 %vm1972_vm2, %v1581_v54 }
 0x2b5   :  { %1586 = vmatpush3.bf16.xpose.msk.msra.mxu1 %vm1972_vm2, %v1581_v54 }
 0x2b6   :  { %1593 = vmatprep.subr.msk.bf16.mxu1 %vm1972_vm2, %v1591_v55 }
 0x2b7   :  { %v398_v57 = vpop.permute.xlu1 %397 }
 0x2bc   :  { %1481 = vmatmul.mubr.msk.f32.vlgmr.msra.gmra.mrb[2].mxu1 %vm201_vm1, %v1956_v43 }
 0x2bd   :  { %1596 = vmatpush3.bf16.xpose.msk.msra.mxu1 %vm1972_vm2, %v1591_v55  ;;  %1494 = vmatprep.mubr.msk.f32.mxu1 %vm201_vm1, %v396_v56 }
 0x2c4   :  { %1495 = vmatmul.mubr.msk.f32.vlgmr.msra.gmra.mrb[4].mxu1 %vm201_vm1, %v398_v57 }
 0x38f   :  { %v1482_v60 = vpop.f32.mrb[2].mxu1 }
 0x390   :  { %v282_v61 = vadd.f32 %v1482_v60, %v1988_v58  ;;  %v276_v62 = vpop.f32.mrb[3].mxu1 }
 0x391   :  { %v277_v63 = vadd.f32 %v276_v62, %v1990_v59 }
 0x392   :  { %v289_v2 = vsel %vm285_vm3, %v282_v61, -inf }
 0x393   :  { %290 = vmax.xlane.f32.xlu1 %v289_v2  ;;  %v286_v3 = vsel %vm285_vm3, %v277_v63, -inf }
 0x394   :  { %287 = vmax.xlane.f32.xlu0 %v286_v3 }
 0x397   :  { %v1496_v4 = vpop.f32.mrb[4].mxu1 }
 0x398   :  { %v477_v5 = vpop.f32.mrb[5].mxu1  ;;  %v483_v7 = vadd.f32 %v1496_v4, %v1988_v58 }
 0x399   :  { %v478_v6 = vadd.f32 %v477_v5, %v1990_v59 }
 0x39a   :  { %v489_v9 = vsel %vm285_vm3, %v483_v7, -inf }
 0x39b   :  { %v486_v8 = vsel %vm285_vm3, %v478_v6, -inf }
 0x39c   :  { %487 = vmax.xlane.f32.xlu0 %v486_v8 }
 0x3a0   :  { %490 = vmax.xlane.f32.xlu0 %v489_v9 }
 0x420   :  { %v291_v10 = vpop.xlane.xlu1 %290 }
 0x421   :  { %v293_v11 = vsub.f32 %v282_v61, %v291_v10  ;;  %v288_v12 = vpop.xlane.xlu0 %287 }
 0x422   :  { %v292_v13 = vsub.f32 %v277_v63, %v288_v12 }
 0x423   :  { %v296_v14 = vmul.f32 1.442695, %v293_v11 }
 0x424   :  { %v294_v15 = vmul.f32 1.442695, %v292_v13 }
 0x425   :  { %1715 = vpow2.f32 %v296_v14 }
 0x426   :  { %1717 = vpow2.f32 %v294_v15 }
 0x429   :  { %v488_v16 = vpop.xlane.xlu0 %487 }
 0x42a   :  { %v492_v17 = vsub.f32 %v478_v6, %v488_v16 }
 0x42c   :  { %v494_v18 = vmul.f32 1.442695, %v492_v17 }
 0x42d   :  { %v491_v19 = vpop.xlane.xlu0 %490 }
 0x42e   :  { %1719 = vpow2.f32 %v494_v18  ;;  %v493_v20 = vsub.f32 %v483_v7, %v491_v19 }
 0x42f   :  { %v1716_v21 = vpop.eup %1715 }
 0x430   :  { %v1718_v22 = vpop.eup %1717  ;;  %v496_v23 = vmul.f32 1.442695, %v493_v20  ;;  %v301_v24 = vsel %vm285_vm3, %v1716_v21, 0.0 }
 0x431   :  { %302 = vadd.xlane.f32.xlu1 %v301_v24  ;;  %v298_v25 = vsel %vm285_vm3, %v1718_v22, 0.0 }
 0x432   :  { %1721 = vpow2.f32 %v496_v23  ;;  %299 = vadd.xlane.f32.xlu0 %v298_v25 }
 0x438   :  { %v1720_v27 = vpop.eup %1719 }
 0x439   :  { %v498_v28 = vsel %vm285_vm3, %v1720_v27, 0.0 }
 0x43a   :  { %499 = vadd.xlane.f32.xlu0 %v498_v28 }
 0x43c   :  { %v1722_v30 = vpop.eup %1721 }
 0x43d   :  { %v501_v31 = vsel %vm285_vm3, %v1722_v30, 0.0 }
 0x43e   :  { %502 = vadd.xlane.f32.xlu1 %v501_v31 }
 0x44f   :  { %1687 = vrot.lane.b32.xlu1 %v1964_v46, %s1830_s21 }
 0x450   :  { %1682 = vrot.lane.b32.xlu0 %v1964_v46, %s1831_s22 }
 0x453   :  { %1692 = vrot.lane.b32.xlu1 %v1964_v46, %s1832_s23 }
 0x454   :  { %597 = vrot.lane.b32.xlu0 %v1956_v43, %s1833_s24 }
 0x457   :  { %595 = vrot.lane.b32.xlu1 %v1958_v45, %s1833_s24 }
 0x4be   :  { %v303_v33 = vpop.xlane.xlu1 %302 }
 0x4bf   :  { %v300_v32 = vpop.xlane.xlu0 %299 }
 0x4c0   :  { %1723 = vrcp.f32 %v300_v32 }
 0x4c1   :  { %1725 = vrcp.f32 %v303_v33 }
 0x4c7   :  { %v500_v34 = vpop.xlane.xlu0 %499 }
 0x4c8   :  { %1727 = vrcp.f32 %v500_v34 }
 0x4ca   :  { %v1724_v35 = vpop.eup %1723 }
 0x4cb   :  { %v503_v36 = vpop.xlane.xlu1 %502  ;;  %v1683_v37 = vpop.permute.xlu0 %1682  ;;  %v305_v38 = vmul.f32 %v1724_v35, %v1718_v22 }
 0x4cc   :  { %1729 = vrcp.f32 %v503_v36  ;;  %v1685_v39 = vunpack.i.h.bf16 %v1683_v37  ;;  %v1684_v40 = vunpack.i.l.bf16 %v1683_v37  ;;  %v1726_v42 = vpop.eup %1725 }
 0x4cd   :  { %1487 = vmatprep.mubr.msk.f32.mxu0 %vm285_vm3, %v305_v38  ;;  %v307_v51 = vmul.f32 %v1726_v42, %v1716_v21 }
 0x4ce   :  { %v1587_v41 = vpack.c.bf16 %v1685_v39, %v1684_v40 }
 0x4cf   :  { %v1688_v44 = vpop.permute.xlu1 %1687  ;;  %v598_v63 = vpop.permute.xlu0 %597 }
 0x4d0   :  { %v1690_v47 = vunpack.i.h.bf16 %v1688_v44  ;;  %v1689_v48 = vunpack.i.l.bf16 %v1688_v44  ;;  %1588 = vmatprep.subr.bf16.mxu0 %v1587_v41 }
 0x4d1   :  { %1590 = vmatpush3.bf16.msra.mxu0 %v1587_v41 }
 0x4d2   :  { %v1728_v49 = vpop.eup %1727  ;;  %v1597_v50 = vpack.c.bf16 %v1690_v47, %v1689_v48 }
 0x4d3   :  { %v1693_v52 = vpop.permute.xlu1 %1692  ;;  %v505_v54 = vmul.f32 %v1728_v49, %v1720_v27 }
 0x4d4   :  { %v1695_v55 = vunpack.i.h.bf16 %v1693_v52  ;;  %v1694_v56 = vunpack.i.l.bf16 %v1693_v52  ;;  %1488 = vmatmul.mubr.msk.f32.vlgmr.msra.gmra.mrb[0].mxu0 %vm285_vm3, %v307_v51  ;;  %1598 = vmatprep.subr.bf16.mxu0 %v1597_v50 }
 0x4d5   :  { %1600 = vmatpush3.bf16.msra.mxu0 %v1597_v50  ;;  %1501 = vmatprep.mubr.msk.f32.mxu0 %vm285_vm3, %v505_v54 }
 0x4d6   :  { %v1730_v57 = vpop.eup %1729  ;;  %v1601_v60 = vpack.c.bf16 %v1695_v55, %v1694_v56 }
 0x4d7   :  { %v507_v61 = vmul.f32 %v1730_v57, %v1722_v30  ;;  %v596_v62 = vpop.permute.xlu1 %595 }
 0x4d8   :  { %1603 = vmatprep.subr.msk.bf16.mxu0 %vm1972_vm2, %v1601_v60 }
 0x4d9   :  { %1502 = vmatmul.mubr.msk.f32.vlgmr.msra.gmra.mrb[2].mxu0 %vm285_vm3, %v507_v61 }
 0x4da   :  { %1508 = vmatprep.mubr.msk.f32.mxu0 %vm201_vm1, %v596_v62 }
 0x4de   :  { %1606 = vmatpush3.bf16.xpose.msk.msra.mxu0 %vm1972_vm2, %v1601_v60 }
 0x4e5   :  { %1509 = vmatmul.mubr.msk.f32.vlgmr.msra.gmra.mrb[4].mxu0 %vm201_vm1, %v598_v63 }
 0x5a7   :  { %v2019_v2 = vpop.f32.mrb[0].mxu0 }
 0x5a8   :  { %v2021_v3 = vpop.f32.mrb[1].mxu0 }
 0x5ac   :  { %v2023_v4 = vpop.f32.mrb[2].mxu0 }
 0x5ad   :  { %v2025_v5 = vpop.f32.mrb[3].mxu0 }
 0x5b8   :  { %v1510_v6 = vpop.f32.mrb[4].mxu0 }
 0x5b9   :  { %v683_v7 = vadd.f32 %v1510_v6, %v1988_v58  ;;  %v677_v8 = vpop.f32.mrb[5].mxu0 }
 0x5ba   :  { %v678_v9 = vadd.f32 %v677_v8, %v1990_v59 }
 0x5bb   :  { %v689_v10 = vsel %vm285_vm3, %v683_v7, -inf }
 0x5bc   :  { %690 = vmax.xlane.f32.xlu0 %v689_v10  ;;  %v686_v11 = vsel %vm285_vm3, %v678_v9, -inf  ;;  %v1028_v10 = vld [vmem:[%s2163_s4 + $0x10] sm:$0xff] }
 0x5bd   :  { %687 = vmax.xlane.f32.xlu1 %v686_v11 }
 0x5ce   :  { %1697 = vrot.lane.b32.xlu1 %v1964_v46, %s1834_s25 }
 0x5d2   :  { %795 = vrot.lane.b32.xlu1 %v1958_v45, %s1835_s26 }
 0x5d6   :  { %797 = vrot.lane.b32.xlu1 %v1956_v43, %s1835_s26 }
 0x649   :  { %v691_v12 = vpop.xlane.xlu0 %690 }
 0x64a   :  { %v693_v13 = vsub.f32 %v683_v7, %v691_v12  ;;  %v688_v14 = vpop.xlane.xlu1 %687  ;;  %v1029_v12 = vld [vmem:[%s2163_s4 + $0x18] sm:$0xff] }
 0x64b   :  { %v692_v15 = vsub.f32 %v678_v9, %v688_v14  ;;  %v1026_v9 = vld [vmem:[%s2163_s4] sm:$0xff] }
 0x64c   :  { %v696_v16 = vmul.f32 1.442695, %v693_v13  ;;  %v1625_v13 = vpack.c.bf16 %v1029_v12, %v1028_v10 }
 0x64d   :  { %v694_v17 = vmul.f32 1.442695, %v692_v15 }
 0x64e   :  { %1731 = vpow2.f32 %v696_v16  ;;  %v1698_v18 = vpop.permute.xlu1 %1697 }
 0x64f   :  { %v1700_v19 = vunpack.i.h.bf16 %v1698_v18  ;;  %v1699_v20 = vunpack.i.l.bf16 %v1698_v18  ;;  %1733 = vpow2.f32 %v694_v17 }
 0x651   :  { %v1607_v21 = vpack.c.bf16 %v1700_v19, %v1699_v20 }
 0x652   :  { %v796_v36 = vpop.permute.xlu1 %795 }
 0x653   :  { %1608 = vmatprep.subr.bf16.mxu1 %v1607_v21 }
 0x654   :  { %1610 = vmatpush3.bf16.msra.mxu1 %v1607_v21 }
 0x656   :  { %v798_v37 = vpop.permute.xlu1 %797 }
 0x658   :  { %v1732_v22 = vpop.eup %1731 }
 0x659   :  { %v701_v23 = vsel %vm285_vm3, %v1732_v22, 0.0  ;;  %v1734_v45 = vpop.eup %1733 }
 0x65a   :  { %702 = vadd.xlane.f32.xlu0 %v701_v23  ;;  %v698_v43 = vsel %vm285_vm3, %v1734_v45, 0.0 }
 0x65e   :  { %699 = vadd.xlane.f32.xlu0 %v698_v43 }
 0x674   :  { %1702 = vrot.lane.b32.xlu0 %v1964_v46, %s1836_s27 }
 0x6e7   :  { %v703_v24 = vpop.xlane.xlu0 %702 }
 0x6e8   :  { %1735 = vrcp.f32 %v703_v24 }
 0x6eb   :  { %v700_v25 = vpop.xlane.xlu0 %699 }
 0x6ec   :  { %1737 = vrcp.f32 %v700_v25 }
 0x6ef   :  { %v1703_v27 = vpop.permute.xlu0 %1702 }
 0x6f0   :  { %v1705_v28 = vunpack.i.h.bf16 %v1703_v27  ;;  %v1704_v30 = vunpack.i.l.bf16 %v1703_v27  ;;  %v1032_v27 = vsub.s32 4, %v1940_v26 }
 0x6f2   :  { %v1611_v31 = vpack.c.bf16 %v1705_v28, %v1704_v30  ;;  %v1736_v32 = vpop.eup %1735 }
 0x6f3   :  { %v707_v35 = vmul.f32 %v1736_v32, %v1732_v22 }
 0x6f4   :  { %1613 = vmatprep.subr.msk.bf16.mxu1 %vm1972_vm2, %v1611_v31 }
 0x6f6   :  { %v1738_v33 = vpop.eup %1737 }
 0x6f7   :  { %v705_v34 = vmul.f32 %v1738_v33, %v1734_v45 }
 0x6f9   :  { %1515 = vmatprep.mubr.msk.f32.mxu1 %vm285_vm3, %v705_v34 }
 0x6fa   :  { %1516 = vmatmul.mubr.msk.f32.vlgmr.msra.gmra.mrb[6].mxu1 %vm285_vm3, %v707_v35 }
 0x6fb   :  { %1616 = vmatpush3.bf16.xpose.msk.msra.mxu1 %vm1972_vm2, %v1611_v31  ;;  %1522 = vmatprep.mubr.msk.f32.mxu1 %vm201_vm1, %v796_v36 }
 0x702   :  { %1523 = vmatmul.mubr.msk.f32.vlgmr.msra.gmra.mrb[8].mxu1 %vm201_vm1, %v798_v37 }
 0x7cd   :  { %v1517_v38 = vpop.f32.mrb[6].mxu1 }
 0x7ce   :  { %v786_v39 = vpop.f32.mrb[7].mxu1 }
 0x7d5   :  { %v1524_v40 = vpop.f32.mrb[8].mxu1 }
 0x7d6   :  { %v883_v41 = vadd.f32 %v1524_v40, %v1988_v58  ;;  %v877_v42 = vpop.f32.mrb[9].mxu1 }
 0x7d7   :  { %v878_v44 = vadd.f32 %v877_v42, %v1990_v59 }
 0x7d8   :  { %v889_v47 = vsel %vm285_vm3, %v883_v41, -inf }
 0x7d9   :  { %890 = vmax.xlane.f32.xlu0 %v889_v47  ;;  %v886_v48 = vsel %vm285_vm3, %v878_v44, -inf  ;;  %v1155_v47 = vld [vmem:[%s2164_s5] sm:$0xff] }
 0x7da   :  { %887 = vmax.xlane.f32.xlu1 %v886_v48  ;;  %v1156_v48 = vld [vmem:[%s2164_s5 + $0x8] sm:$0xff] }
 0x7eb   :  { %1707 = vrot.lane.b32.xlu1 %v1964_v46, %s1837_s29 }
 0x7ef   :  { %999 = vrot.lane.b32.xlu1 %v2023_v4, %s1825_s16 }
 0x7f3   :  { %1005 = vrot.lane.b32.xlu1 %v786_v39, %s1838_s0 }
 0x7f7   :  { %1007 = vrot.lane.b32.xlu1 %v1517_v38, %s1838_s0 }
 0x866   :  { %v891_v53 = vpop.xlane.xlu0 %890 }
 0x867   :  { %v893_v58 = vsub.f32 %v883_v41, %v891_v53  ;;  %v888_v49 = vpop.xlane.xlu1 %887  ;;  %v1629_v53 = vpack.c.bf16 %v1156_v48, %v1155_v47 }
 0x868   :  { %v892_v50 = vsub.f32 %v878_v44, %v888_v49  ;;  %v1158_v49 = vld [vmem:[%s2164_s5 + $0x18] sm:$0xff] }
 0x869   :  { %v896_v59 = vmul.f32 1.442695, %v893_v58  ;;  %1630 = vmatprep.subr.bf16.mxu1 %v1629_v53  ;;  %v1157_v58 = vld [vmem:[%s2164_s5 + $0x10] sm:$0xff] }
 0x86a   :  { %v894_v51 = vmul.f32 1.442695, %v892_v50  ;;  %1632 = vmatpush3.bf16.msra.mxu1 %v1629_v53  ;;  %v1633_v50 = vpack.c.bf16 %v1158_v49, %v1157_v58 }
 0x86b   :  { %v1708_v52 = vpop.permute.xlu1 %1707 }
 0x86c   :  { %1739 = vpow2.f32 %v894_v51  ;;  %v1710_v54 = vunpack.i.h.bf16 %v1708_v52  ;;  %v1709_v55 = vunpack.i.l.bf16 %v1708_v52  ;;  %1634 = vmatprep.subr.bf16.mxu1 %v1633_v50  ;;  %v1251_v51 = vld [vmem:[%s2165_s6 + $0x8] sm:$0xff]  ;;  %v1252_v52 = vld [vmem:[%s2165_s6 + $0x10] sm:$0xff] }
 0x86d   :  { %1741 = vpow2.f32 %v896_v59  ;;  %v1250_v59 = vld [vmem:[%s2165_s6] sm:$0xff] }
 0x86e   :  { %v1617_v56 = vpack.c.bf16 %v1710_v54, %v1709_v55  ;;  %1636 = vmatpush3.bf16.msra.mxu1 %v1633_v50  ;;  %v1637_v54 = vpack.c.bf16 %v1251_v51, %v1250_v59  ;;  %v1253_v55 = vld [vmem:[%s2165_s6 + $0x18] sm:$0xff] }
 0x86f   :  { %v1000_v16 = vpop.permute.xlu1 %999 }
 0x870   :  { %1618 = vmatprep.subr.bf16.mxu0 %v1617_v56  ;;  %v1020_v22 = vsel %vm201_vm1, %v2019_v2, %v1000_v16  ;;  %v1254_v16 = vld [vmem:[%s2165_s6 + $0x20] sm:$0xff] }
 0x871   :  { %1620 = vmatpush3.bf16.msra.mxu0 %v1617_v56  ;;  %v1641_v56 = vpack.c.bf16 %v1253_v55, %v1252_v52 }
 0x873   :  { %v1006_v17 = vpop.permute.xlu1 %1005 }
 0x876   :  { %v1740_v46 = vpop.eup %1739 }
 0x877   :  { %v898_v57 = vsel %vm285_vm3, %v1740_v46, 0.0  ;;  %v1742_v60 = vpop.eup %1741  ;;  %v1008_v19 = vpop.permute.xlu1 %1007 }
 0x878   :  { %899 = vadd.xlane.f32.xlu0 %v898_v57  ;;  %v901_v61 = vsel %vm285_vm3, %v1742_v60, 0.0  ;;  %v1022_v43 = vsel %vm285_vm3, %v1020_v22, %v1008_v19  ;;  %v1256_v19 = vld [vmem:[%s2165_s6 + $0x30] sm:$0xff]  ;;  %v1161_v22 = vsub.s32 5, %v1940_v26 }
 0x87c   :  { %902 = vadd.xlane.f32.xlu0 %v901_v61 }
 0x892   :  { %997 = vrot.lane.b32.xlu0 %v2025_v5, %s1825_s16  ;;  %v1027_v5 = vld [vmem:[%s2163_s4 + $0x8] sm:$0xff] }
 0x893   :  { %v1621_v11 = vpack.c.bf16 %v1027_v5, %v1026_v9 }
 0x895   :  { %1622 = vmatprep.subr.bf16.mxu0 %v1621_v11 }
 0x905   :  { %v900_v62 = vpop.xlane.xlu0 %899 }
 0x906   :  { %1743 = vrcp.f32 %v900_v62 }
 0x909   :  { %v903_v63 = vpop.xlane.xlu0 %902 }
 0x90a   :  { %1745 = vrcp.f32 %v903_v63 }
 0x90d   :  { %v998_v18 = vpop.permute.xlu0 %997 }
 0x90e   :  { %v1019_v20 = vsel %vm201_vm1, %v2021_v3, %v998_v18  ;;  %v1033_v3 = vrot.slane %v1946_v29, %v1032_v27 }
 0x90f   :  { %v1021_v23 = vsel %vm285_vm3, %v1019_v20, %v1006_v17  ;;  %v1255_v17 = vld [vmem:[%s2165_s6 + $0x28] sm:$0xff]  ;;  %v1257_v20 = vld [vmem:[%s2165_s6 + $0x38] sm:$0xff]  ;;  %s1840_s6 = smov [#allocation7]  }
 0x910   :  { %v1744_v4 = vpop.eup %1743  ;;  %v1645_v18 = vpack.c.bf16 %v1255_v17, %v1254_v16  ;;  %s1359_s12 = sshll.u32 %s1840_s6, 4  ;;  %s1360_s12 = int_to_ptr.vmem [resolvable:$true] %s1359_s12 }
 0x911   :  { %v905_v6 = vmul.f32 %v1744_v4, %v1740_v46  ;;  %v1145_v4 = vsub.s32 2, %v1940_v26  ;;  %s1795_s13 = scalar_lea.vmem %s1360_s12, 256  ;;  %p1800_p3 = scmp.lt.s32.totalorder %s1360_s12, %s1360_s12 }
 0x912   :  { %p1796_p2 = scmp.ne.s32.totalorder %s1360_s12, %s1795_s13  ;;  %p1801_p4 = scmp.lt.s32.totalorder %s1795_s13, %s1795_s13 }
 0x913   :  { %1529 = vmatprep.mubr.msk.f32.mxu0 %vm285_vm3, %v905_v6  ;;  %v1151_v6 = vsub.s32 3, %v1940_v26 }
 0x914   :  { %v1746_v7 = vpop.eup %1745  ;;  %p1802_p5 = por %p1801_p4, %p1800_p3 }
 0x915   :  { %v907_v8 = vmul.f32 %v1746_v7, %v1742_v60  ;;  %v1146_v7 = vrot.slane %v1946_v29, %v1145_v4  ;;  %v1152_v5 = vrot.slane %v1946_v29, %v1151_v6 }
 0x916   :  { %p1803_p6 = pnand %p1802_p5, %p1796_p2 }
 0x917   :  { %1530 = vmatmul.mubr.msk.f32.vlgmr.msra.gmra.mrb[6].mxu0 %vm285_vm3, %v907_v8 }
 0x918   :  { %1624 = vmatpush3.bf16.msra.mxu0 %v1621_v11 }
 0x919   :  { %1626 = vmatprep.subr.bf16.mxu0 %v1625_v13 }
 0x91c   :  { %1628 = vmatpush3.bf16.msra.mxu0 %v1625_v13 }
 0x91d   :  { %1638 = vmatprep.subr.bf16.mxu0 %v1637_v54 }
 0x9ea   :  { %v1531_v14 = vpop.f32.mrb[6].mxu0 }
 0x9eb   :  { %1015 = vrot.lane.b32.xlu1 %v1531_v14, %s1839_s14  ;;  %v986_v15 = vpop.f32.mrb[7].mxu0 }
 0x9ec   :  { %1013 = vrot.lane.b32.xlu0 %v986_v15, %s1839_s14 }
 0xa5d   :  { %v1016_v21 = vpop.permute.xlu1 %1015 }
 0xa5e   :  { %v1014_v45 = vpop.permute.xlu0 %1013  ;;  %v1025_v25 = vsel %vm1023_vm4, %v1022_v43, %v1016_v21  ;;  %v1649_v21 = vpack.c.bf16 %v1257_v20, %v1256_v19 }
 0xa5f   :  { %v1024_v24 = vsel %vm1023_vm4, %v1021_v23, %v1014_v45  ;;  %v1162_v23 = vrot.slane %v1946_v29, %v1161_v22 }
 0xa60   :  { %1540 = vmatprep.mubr.msk.f32.mxu0 %vm61_vm0, %v1024_v24 }
 0xa61   :  { %1541 = vmatmul.mubr.msk.f32.vlgmr.msra.gmra.mrb[8].mxu0 %vm61_vm0, %v1025_v25 }
 0xa62   :  { %1640 = vmatpush3.bf16.msra.mxu0 %v1637_v54 }
 0xa63   :  { %1642 = vmatprep.subr.bf16.mxu0 %v1641_v56 }
 0xa66   :  { %1644 = vmatpush3.bf16.msra.mxu0 %v1641_v56 }
 0xa67   :  { %1646 = vmatprep.subr.bf16.mxu0 %v1645_v18 }
 0xa6a   :  { %1648 = vmatpush3.bf16.msra.mxu0 %v1645_v18 }
 0xa6b   :  { %1650 = vmatprep.subr.bf16.mxu0 %v1649_v21 }
 0xa6e   :  { %1652 = vmatpush3.bf16.msra.mxu0 %v1649_v21 }
 0xb34   :  { %v1542_v28 = vpop.f32.mrb[8].mxu0 }
 0xb35   :  { %v1112_v30 = vadd.f32 %v1542_v28, %v1033_v3  ;;  %v1106_v31 = vpop.f32.mrb[9].mxu0 }
 0xb36   :  { %v1107_v32 = vadd.f32 %v1106_v31, %v1033_v3  ;;  %v1260_v31 = vsub.s32 6, %v1940_v26 }
 0xb37   :  { %v2081_v2 = vadd.f32 %v1112_v30, %v1918_v1 }
 0xb38   :  { %v2084_v33 = vadd.f32 %v1107_v32, %v1916_v0  ;;  %v1261_v32 = vrot.slane %v1946_v29, %v1260_v31 }
 0xb39   :  { %v1120_v34 = vsel %vm61_vm0, %v2081_v2, 0.0 }
 0xb3a   :  { %1121 = vadd.xlane.f32.xlu1 %v1120_v34  ;;  %v1117_v35 = vsel %vm61_vm0, %v2084_v33, 0.0 }
 0xb3b   :  { %1118 = vadd.xlane.f32.xlu0 %v1117_v35 }
 0xbc7   :  { %v1122_v36 = vpop.xlane.xlu1 %1121 }
 0xbc8   :  { %v1124_v37 = vmul.f32 0.03125, %v1122_v36  ;;  %v1119_v38 = vpop.xlane.xlu0 %1118 }
 0xbc9   :  { %v1123_v39 = vmul.f32 0.03125, %v1119_v38 }
 0xbca   :  { %v1126_v40 = vsub.f32 %v2081_v2, %v1124_v37 }
 0xbcb   :  { %v1125_v1 = vsub.f32 %v2084_v33, %v1123_v39 }
 0xbcc   :  { %v1128_v42 = vmul.f32 %v1126_v40, %v1126_v40 }
 0xbcd   :  { %v1127_v41 = vmul.f32 %v1125_v1, %v1125_v1 }
 0xbce   :  { %v1132_v44 = vsel %vm61_vm0, %v1128_v42, 0.0 }
 0xbcf   :  { %v1129_v0 = vsel %vm61_vm0, %v1127_v41, 0.0 }
 0xbd0   :  { %1130 = vadd.xlane.f32.xlu0 %v1129_v0 }
 0xbd4   :  { %1133 = vadd.xlane.f32.xlu0 %v1132_v44 }
 0xc5d   :  { %v1131_v46 = vpop.xlane.xlu0 %1130 }
 0xc5e   :  { %v1135_v57 = vmul.f32 0.03125, %v1131_v46 }
 0xc60   :  { %v1137_v60 = vadd.f32 1e-05, %v1135_v57 }
 0xc61   :  { %v1134_v61 = vpop.xlane.xlu0 %1133 }
 0xc62   :  { %1747 = vrsqrt.f32 %v1137_v60  ;;  %v1136_v62 = vmul.f32 0.03125, %v1134_v61 }
 0xc64   :  { %v1138_v63 = vadd.f32 1e-05, %v1136_v62 }
 0xc66   :  { %1749 = vrsqrt.f32 %v1138_v63 }
 0xc6c   :  { %v1748_v8 = vpop.eup %1747 }
 0xc6d   :  { %v1141_v9 = vmul.f32 %v1748_v8, %v1125_v1 }
 0xc6f   :  { %v1147_v10 = vmul.f32 %v1146_v7, %v1141_v9 }
 0xc70   :  { %v1750_v11 = vpop.eup %1749 }
 0xc71   :  { %v1142_v12 = vmul.f32 %v1750_v11, %v1126_v40  ;;  %v1153_v13 = vadd.f32 %v1152_v5, %v1147_v10 }
 0xc73   :  { %v1148_v14 = vmul.f32 %v1146_v7, %v1142_v12  ;;  %1551 = vmatprep.mubr.msk.f32.mxu1 %vm61_vm0, %v1153_v13 }
 0xc75   :  { %v1154_v15 = vadd.f32 %v1152_v5, %v1148_v14 }
 0xc77   :  { %1552 = vmatmul.mubr.msk.f32.vlgmr.msra.gmra.mrb[10].mxu1 %vm61_vm0, %v1154_v15 }
 0xd4a   :  { %v1553_v45 = vpop.f32.mrb[10].mxu1 }
 0xd4b   :  { %v1241_v43 = vadd.f32 %v1553_v45, %v1162_v23  ;;  %v1235_v24 = vpop.f32.mrb[11].mxu1 }
 0xd4c   :  { %v1236_v25 = vadd.f32 %v1235_v24, %v1162_v23 }
 0xd4d   :  { %v1247_v27 = vmul.f32 0.01, %v1241_v43  ;;  %vm1245_vm5 = vcmp.ge.f32.partialorder %v1241_v43, 0.0 }
 0xd4e   :  { %vm1244_vm6 = vcmp.ge.f32.partialorder %v1236_v25, 0.0  ;;  %v1246_v3 = vmul.f32 0.01, %v1236_v25 }
 0xd4f   :  { %v1249_v30 = vsel %vm1245_vm5, %v1241_v43, %v1247_v27 }
 0xd50   :  { %v1248_v28 = vsel %vm1244_vm6, %v1236_v25, %v1246_v3 }
 0xd51   :  { %1570 = vmatprep.mubr.msk.f32.mxu0 %vm1262_vm7, %v1248_v28 }
 0xd52   :  { %1571 = vmatmul.mubr.msk.f32.vlgmr.msra.gmra.mrb[10].mxu0 %vm1262_vm7, %v1249_v30 }
 0xe25   :  { %v1572_v34 = vpop.f32.mrb[10].mxu0 }
 0xe26   :  { %v1341_v35 = vadd.f32 %v1572_v34, %v1261_v32  ;;  %v1335_v36 = vpop.f32.mrb[11].mxu0 }
 0xe27   :  { %v1336_v37 = vadd.f32 %v1335_v36, %v1261_v32 }
 0xe28   :  { %vm1345_vm8 = vcmp.ge.f32.partialorder %v1341_v35, 0.0  ;;  %v1347_v38 = vmul.f32 0.01, %v1341_v35 }
 0xe29   :  { %vm1344_vm9 = vcmp.ge.f32.partialorder %v1336_v37, 0.0  ;;  %v1346_v39 = vmul.f32 0.01, %v1336_v37 }
 0xe2a   :  { %v1349_v40 = vsel %vm1345_vm8, %v1341_v35, %v1347_v38 }
 0xe2b   :  { %v1351_v1 = vadd.f32 %v1349_v40, %v2081_v2  ;;  %v1348_v41 = vsel %vm1344_vm9, %v1336_v37, %v1346_v39 }
 0xe2c   :  { %v1350_v0 = vadd.f32 %v1348_v41, %v2084_v33 }
 0xe2d   :  { %1353 = vst.msk [vmem:[#allocation7 + $0x8] sm:$0xff] %vm61_vm0, %v1351_v1 }
 0xe2e   :  { %1352 = vst.msk [vmem:[#allocation7] sm:$0xff] %vm61_vm0, %v1350_v0 }
 0xe2f   :  { %1806 = shalt.err (!%p1803_p6)
}
 0xe30   :  { %s1807_s17 = scalar_lea.hbm %s2167_s8, 256 }
 0xe31   :  { %p1808_p7 = scmp.ne.s32.totalorder %s2167_s8, %s1807_s17  ;;  %p1811_p8 = scmp.lt.u32.totalorder %s1807_s17, %s2167_s8 }
 0xe33   :  { %p1813_p9 = pnand %p1811_p8, %p1808_p7 }
 0xe35   :  { %1816 = shalt.err (!%p1813_p9)
}
 0xe36   :  { %1365 = dma.vmem_to_hbm [thread:$0]  %s1360_s12, 256, %s2167_s8, [#allocation4], %s1824_s15, %s1824_s15, %s1825_s16  }
 0xe37   :  { %1821 = dma.done.wait [#allocation4], 256  }
 0xe38   :  { %1822 = vsyncadd [#allocation4], 4294967040 }
 0xe39   :  { %1369 = vsyncpa [#allocation3], 1 }
 0xe3a   :  { %1370 = vsyncpa [#allocation6], 1 }
 0xe3b   :  { %1371 = vsyncpa [#allocation4], 1 }

</bundles_post_ra>
